<compile_context>
chip_gen: v7x
topology: tpu7x:2x2x1
jax: 0.10.0
libtpu: 0.0.40
codegen_flags: <defaults>
</compile_context>

<pallas_src>
import jax
import jax.numpy as jnp
from jax.experimental import pallas as pl
from jax.experimental.pallas import tpu as pltpu


def mlp_kernel(x_ref,
               w0_ref, b0_ref,
               w1_ref, b1_ref,
               w2_ref, b2_ref,
               w3_ref, b3_ref,
               o_ref):
    """Fused 4-layer MLP in transposed (features, batch) layout.

    x_ref:  (11, tile_n)   compute-dtype activations, batch on lanes
    wK_ref: (out, in)      compute-dtype weights (PyTorch layout)
    bK_ref: (out, 1)       f32 biases (broadcast over lanes)
    o_ref:  (1, tile_n)    f32 output (lane-dense, unmasked stores)
    """
    cd = w0_ref.dtype  # compute dtype for MXU operands (bf16 by default)

    h = x_ref[...]                                                           # (11, T)
    h = jnp.dot(w0_ref[...], h, preferred_element_type=jnp.float32) + b0_ref[...]
    h = jnp.maximum(h, 0.0)                                                  # (16, T) f32
    h = jnp.dot(w1_ref[...], h.astype(cd),
                preferred_element_type=jnp.float32) + b1_ref[...]
    h = jnp.maximum(h, 0.0)                                                  # (32, T) f32
    h = jnp.dot(w2_ref[...], h.astype(cd),
                preferred_element_type=jnp.float32) + b2_ref[...]
    h = jnp.maximum(h, 0.0)                                                  # (32, T) f32
    out = jnp.dot(w3_ref[...], h.astype(cd),
                  preferred_element_type=jnp.float32) + b3_ref[...]          # (1, T)  f32
    o_ref[...] = out.astype(o_ref.dtype)


def _choose_tiling(n_rows, tile_n):
    """Pick a lane-dense tile (multiple of 128) and an even grid (>=2 steps)."""
    eff_tile = min(tile_n, 128 * pl.cdiv(n_rows, 256))
    eff_tile = max(128, (eff_tile // 128) * 128)
    num_tiles = pl.cdiv(n_rows, eff_tile)
    if num_tiles % 2:
        num_tiles += 1  # keep both v7x TensorCores busy; harmless on v5e/v6e
    return eff_tile, num_tiles


def ann_wine_forward(x, params, *, tile_n=1024, compute_dtype=jnp.bfloat16):
    """x: (N, 11) float32.  params: PyTorch-layout weights (out,in) / biases (out,).

    Returns (N, 1) float32, matching ANNwine.forward.
    """
    N, d_in = x.shape
    assert d_in == 11

    eff_tile, num_tiles = _choose_tiling(N, tile_n)
    n_pad = eff_tile * num_tiles

    # Layout plumbing in the wrapper: pad ragged batch, transpose to (11, N_pad),
    # cast MXU operands to the compute dtype (f32 accumulation inside the kernel).
    x_t = jnp.pad(x, ((0, n_pad - N), (0, 0))).T.astype(compute_dtype)       # (11, n_pad)

    def w(name):
        return params[name].astype(compute_dtype)                            # (out, in)

    def b(name):
        return params[name].astype(jnp.float32).reshape(-1, 1)               # (out, 1)

    w0, b0 = w("w0"), b("b0")
    w1, b1 = w("w1"), b("b1")
    w2, b2 = w("w2"), b("b2")
    w3, b3 = w("w3"), b("b3")

    def replicated(arr):
        # Whole array as one block; same block every grid step -> fetched once.
        return pl.BlockSpec(arr.shape, lambda i: (0, 0))

    out = pl.pallas_call(
        mlp_kernel,
        out_shape=jax.ShapeDtypeStruct((1, n_pad), jnp.float32),
        grid_spec=pltpu.PrefetchScalarGridSpec(
            num_scalar_prefetch=0,
            grid=(num_tiles,),
            in_specs=[
                pl.BlockSpec((11, eff_tile), lambda i: (0, i)),   # batch tile on lanes
                replicated(w0), replicated(b0),
                replicated(w1), replicated(b1),
                replicated(w2), replicated(b2),
                replicated(w3), replicated(b3),
            ],
            out_specs=pl.BlockSpec((1, eff_tile), lambda i: (0, i)),  # lane-dense output
        ),
        compiler_params=pltpu.CompilerParams(
            dimension_semantics=("parallel",)),
    )(x_t, w0, b0, w1, b1, w2, b2, w3, b3)

    return out.T[:N]                                                          # (N, 1) f32


def init_params(key):
    """nn.Linear-style init U(-1/sqrt(fan_in), 1/sqrt(fan_in)); PyTorch (out,in) layout."""
    dims = [(11, 16), (16, 32), (32, 32), (32, 1)]
    params = {}
    keys = jax.random.split(key, 2 * len(dims))
    for idx, (d_in, d_out) in enumerate(dims):
        bound = 1.0 / (d_in ** 0.5)
        params[f"w{idx}"] = jax.random.uniform(
            keys[2 * idx], (d_out, d_in), minval=-bound, maxval=bound, dtype=jnp.float32)
        params[f"b{idx}"] = jax.random.uniform(
            keys[2 * idx + 1], (d_out,), minval=-bound, maxval=bound, dtype=jnp.float32)
    return params


def reference_forward(x, params, cast_dtype=None):
    """Pure-JAX reference. If cast_dtype is given, mimic the kernel's operand
    quantization (bf16 MXU operands, f32 accumulate / bias / ReLU)."""
    def c(a):
        return a.astype(cast_dtype).astype(jnp.float32) if cast_dtype is not None else a

    h = c(x)
    h = jnp.maximum(h @ c(params["w0"]).T + params["b0"], 0.0)
    h = jnp.maximum(c(h) @ c(params["w1"]).T + params["b1"], 0.0)
    h = jnp.maximum(c(h) @ c(params["w2"]).T + params["b2"], 0.0)
    return c(h) @ c(params["w3"]).T + params["b3"]


if __name__ == "__main__":
    key = jax.random.PRNGKey(0)
    k_param, k_x = jax.random.split(key)
    params = init_params(k_param)

    N = 32  # small batch; wine rows have 11 features (ragged vs. 128-tile is handled by padding)
    x = jax.random.normal(k_x, (N, 11), dtype=jnp.float32)

    out = ann_wine_forward(x, params)
    out = jax.block_until_ready(out)
    assert out.shape == (N, 1)

    # Bit-for-bit-ish check against a reference that uses the same operand dtypes.
    ref_bf16 = reference_forward(x, params, cast_dtype=jnp.bfloat16).reshape(N, 1)
    assert jnp.allclose(out, ref_bf16, atol=2e-3, rtol=2e-3), \
        "Pallas output mismatch vs bf16-operand reference"

    # Functional check against the full-f32 PyTorch-semantics reference (bf16 quantization slack).
    ref_f32 = reference_forward(x, params).reshape(N, 1)
    assert jnp.allclose(out, ref_f32, atol=5e-2, rtol=5e-2), \
        "Pallas output mismatch vs f32 reference"

    print("KERNEL_OK")
</pallas_src>

<mosaic_0001>
module attributes {stable_mosaic.version = 11 : i64} {
  func.func @mlp_kernel(%arg0: i32, %arg1: memref<11x128xbf16, #tpu.memory_space<vmem>>, %arg2: memref<16x11xbf16, #tpu.memory_space<vmem>>, %arg3: memref<16x1xf32, #tpu.memory_space<vmem>>, %arg4: memref<32x16xbf16, #tpu.memory_space<vmem>>, %arg5: memref<32x1xf32, #tpu.memory_space<vmem>>, %arg6: memref<32x32xbf16, #tpu.memory_space<vmem>>, %arg7: memref<32x1xf32, #tpu.memory_space<vmem>>, %arg8: memref<1x32xbf16, #tpu.memory_space<vmem>>, %arg9: memref<1x1xf32, #tpu.memory_space<vmem>>, %arg10: memref<1x128xf32, #tpu.memory_space<vmem>>) attributes {dimension_semantics = [#tpu.dimension_semantics<parallel>], iteration_bounds = array<i64: 2>, scalar_prefetch = 0 : i64, scratch_operands = 0 : i64, tpu.core_type = #tpu.core_type<tc>, window_params = [{transform_indices = @transform_0, window_bounds = array<i64: 11, 128>}, {pipeline_mode = #tpu.pipeline_mode<synchronous>, transform_indices = @transform_1, window_bounds = array<i64: 16, 11>}, {pipeline_mode = #tpu.pipeline_mode<synchronous>, transform_indices = @transform_2, window_bounds = array<i64: 16, 1>}, {pipeline_mode = #tpu.pipeline_mode<synchronous>, transform_indices = @transform_3, window_bounds = array<i64: 32, 16>}, {pipeline_mode = #tpu.pipeline_mode<synchronous>, transform_indices = @transform_4, window_bounds = array<i64: 32, 1>}, {pipeline_mode = #tpu.pipeline_mode<synchronous>, transform_indices = @transform_5, window_bounds = array<i64: 32, 32>}, {pipeline_mode = #tpu.pipeline_mode<synchronous>, transform_indices = @transform_6, window_bounds = array<i64: 32, 1>}, {pipeline_mode = #tpu.pipeline_mode<synchronous>, transform_indices = @transform_7, window_bounds = array<i64: 1, 32>}, {pipeline_mode = #tpu.pipeline_mode<synchronous>, transform_indices = @transform_8, window_bounds = array<i64: 1, 1>}, {transform_indices = @transform_9, window_bounds = array<i64: 1, 128>}]} {
    %c0 = arith.constant 0 : index
    %c0_0 = arith.constant 0 : index
    %0 = vector.load %arg1[%c0, %c0_0] : memref<11x128xbf16, #tpu.memory_space<vmem>>, vector<11x128xbf16>
    %c0_1 = arith.constant 0 : index
    %c0_2 = arith.constant 0 : index
    %1 = vector.load %arg2[%c0_1, %c0_2] : memref<16x11xbf16, #tpu.memory_space<vmem>>, vector<16x11xbf16>
    %cst = arith.constant dense<0.000000e+00> : vector<16x128xf32>
    %2 = tpu.matmul %1, %0, %cst {dimension_numbers = #tpu.dot_dimension_numbers<[1], [0], [0], [1], [0, 0, 1, 1], [], []>} : vector<16x11xbf16>, vector<11x128xbf16>, vector<16x128xf32> -> vector<16x128xf32>
    %c0_3 = arith.constant 0 : index
    %c0_4 = arith.constant 0 : index
    %3 = vector.load %arg3[%c0_3, %c0_4] : memref<16x1xf32, #tpu.memory_space<vmem>>, vector<16x1xf32>
    %4 = vector.broadcast %3 : vector<16x1xf32> to vector<16x128xf32>
    %5 = arith.addf %2, %4 : vector<16x128xf32>
    %cst_5 = arith.constant 0.000000e+00 : f32
    %6 = vector.broadcast %cst_5 : f32 to vector<16x128xf32>
    %7 = arith.maximumf %5, %6 : vector<16x128xf32>
    %c0_6 = arith.constant 0 : index
    %c0_7 = arith.constant 0 : index
    %8 = vector.load %arg4[%c0_6, %c0_7] : memref<32x16xbf16, #tpu.memory_space<vmem>>, vector<32x16xbf16>
    %9 = arith.truncf %7 : vector<16x128xf32> to vector<16x128xbf16>
    %cst_8 = arith.constant dense<0.000000e+00> : vector<32x128xf32>
    %10 = tpu.matmul %8, %9, %cst_8 {dimension_numbers = #tpu.dot_dimension_numbers<[1], [0], [0], [1], [0, 0, 1, 1], [], []>} : vector<32x16xbf16>, vector<16x128xbf16>, vector<32x128xf32> -> vector<32x128xf32>
    %c0_9 = arith.constant 0 : index
    %c0_10 = arith.constant 0 : index
    %11 = vector.load %arg5[%c0_9, %c0_10] : memref<32x1xf32, #tpu.memory_space<vmem>>, vector<32x1xf32>
    %12 = vector.broadcast %11 : vector<32x1xf32> to vector<32x128xf32>
    %13 = arith.addf %10, %12 : vector<32x128xf32>
    %cst_11 = arith.constant 0.000000e+00 : f32
    %14 = vector.broadcast %cst_11 : f32 to vector<32x128xf32>
    %15 = arith.maximumf %13, %14 : vector<32x128xf32>
    %c0_12 = arith.constant 0 : index
    %c0_13 = arith.constant 0 : index
    %16 = vector.load %arg6[%c0_12, %c0_13] : memref<32x32xbf16, #tpu.memory_space<vmem>>, vector<32x32xbf16>
    %17 = arith.truncf %15 : vector<32x128xf32> to vector<32x128xbf16>
    %cst_14 = arith.constant dense<0.000000e+00> : vector<32x128xf32>
    %18 = tpu.matmul %16, %17, %cst_14 {dimension_numbers = #tpu.dot_dimension_numbers<[1], [0], [0], [1], [0, 0, 1, 1], [], []>} : vector<32x32xbf16>, vector<32x128xbf16>, vector<32x128xf32> -> vector<32x128xf32>
    %c0_15 = arith.constant 0 : index
    %c0_16 = arith.constant 0 : index
    %19 = vector.load %arg7[%c0_15, %c0_16] : memref<32x1xf32, #tpu.memory_space<vmem>>, vector<32x1xf32>
    %20 = vector.broadcast %19 : vector<32x1xf32> to vector<32x128xf32>
    %21 = arith.addf %18, %20 : vector<32x128xf32>
    %cst_17 = arith.constant 0.000000e+00 : f32
    %22 = vector.broadcast %cst_17 : f32 to vector<32x128xf32>
    %23 = arith.maximumf %21, %22 : vector<32x128xf32>
    %c0_18 = arith.constant 0 : index
    %c0_19 = arith.constant 0 : index
    %24 = vector.load %arg8[%c0_18, %c0_19] : memref<1x32xbf16, #tpu.memory_space<vmem>>, vector<1x32xbf16>
    %25 = arith.truncf %23 : vector<32x128xf32> to vector<32x128xbf16>
    %cst_20 = arith.constant dense<0.000000e+00> : vector<1x128xf32>
    %26 = tpu.matmul %24, %25, %cst_20 {dimension_numbers = #tpu.dot_dimension_numbers<[1], [0], [0], [1], [0, 0, 1, 1], [], []>} : vector<1x32xbf16>, vector<32x128xbf16>, vector<1x128xf32> -> vector<1x128xf32>
    %c0_21 = arith.constant 0 : index
    %c0_22 = arith.constant 0 : index
    %27 = vector.load %arg9[%c0_21, %c0_22] : memref<1x1xf32, #tpu.memory_space<vmem>>, vector<1x1xf32>
    %28 = vector.broadcast %27 : vector<1x1xf32> to vector<1x128xf32>
    %29 = arith.addf %26, %28 : vector<1x128xf32>
    %c0_23 = arith.constant 0 : index
    %c0_24 = arith.constant 0 : index
    %30 = vector.load %arg10[%c0_23, %c0_24] : memref<1x128xf32, #tpu.memory_space<vmem>>, vector<1x128xf32>
    tpu.vector_store %arg10[%c0_23, %c0_24], %29 {strides = array<i32>} : memref<1x128xf32, #tpu.memory_space<vmem>>, vector<1x128xf32>,
    return
  }
  func.func @transform_0(%arg0: i32) -> (i32, i32) {
    %c0_i32 = arith.constant 0 : i32
    %c0_i32_0 = arith.constant 0 : i32
    return %c0_i32, %arg0 : i32, i32
  }
  func.func @transform_1(%arg0: i32) -> (i32, i32) {
    %c0_i32 = arith.constant 0 : i32
    %c0_i32_0 = arith.constant 0 : i32
    %c0_i32_1 = arith.constant 0 : i32
    return %c0_i32, %c0_i32_0 : i32, i32
  }
  func.func @transform_2(%arg0: i32) -> (i32, i32) {
    %c0_i32 = arith.constant 0 : i32
    %c0_i32_0 = arith.constant 0 : i32
    %c0_i32_1 = arith.constant 0 : i32
    return %c0_i32, %c0_i32_0 : i32, i32
  }
  func.func @transform_3(%arg0: i32) -> (i32, i32) {
    %c0_i32 = arith.constant 0 : i32
    %c0_i32_0 = arith.constant 0 : i32
    %c0_i32_1 = arith.constant 0 : i32
    return %c0_i32, %c0_i32_0 : i32, i32
  }
  func.func @transform_4(%arg0: i32) -> (i32, i32) {
    %c0_i32 = arith.constant 0 : i32
    %c0_i32_0 = arith.constant 0 : i32
    %c0_i32_1 = arith.constant 0 : i32
    return %c0_i32, %c0_i32_0 : i32, i32
  }
  func.func @transform_5(%arg0: i32) -> (i32, i32) {
    %c0_i32 = arith.constant 0 : i32
    %c0_i32_0 = arith.constant 0 : i32
    %c0_i32_1 = arith.constant 0 : i32
    return %c0_i32, %c0_i32_0 : i32, i32
  }
  func.func @transform_6(%arg0: i32) -> (i32, i32) {
    %c0_i32 = arith.constant 0 : i32
    %c0_i32_0 = arith.constant 0 : i32
    %c0_i32_1 = arith.constant 0 : i32
    return %c0_i32, %c0_i32_0 : i32, i32
  }
  func.func @transform_7(%arg0: i32) -> (i32, i32) {
    %c0_i32 = arith.constant 0 : i32
    %c0_i32_0 = arith.constant 0 : i32
    %c0_i32_1 = arith.constant 0 : i32
    return %c0_i32, %c0_i32_0 : i32, i32
  }
  func.func @transform_8(%arg0: i32) -> (i32, i32) {
    %c0_i32 = arith.constant 0 : i32
    %c0_i32_0 = arith.constant 0 : i32
    %c0_i32_1 = arith.constant 0 : i32
    return %c0_i32, %c0_i32_0 : i32, i32
  }
  func.func @transform_9(%arg0: i32) -> (i32, i32) {
    %c0_i32 = arith.constant 0 : i32
    %c0_i32_0 = arith.constant 0 : i32
    return %c0_i32, %arg0 : i32, i32
  }
}

</mosaic_0001>

<bundles_post_ra>
// kernel: tpu_custom_call.1
= control target key start
LH: loop header
LB: loop body
LE: loop exit
PB: predicated region body
PF: predicated region fallthrough
CT: control target
= control target key end

     0   :  { %s1193_s0 = inlined_call_operand.vmem [shape: bf16[11,256], index: 0, kind: input, shape index: {}]   ;;  %s1194_s1 = inlined_call_operand.vmem [shape: bf16[16,11], index: 1, kind: input, shape index: {}]   ;;  %s1195_s2 = inlined_call_operand.vmem [shape: f32[16,1], index: 2, kind: input, shape index: {}]   ;;  %s1196_s3 = inlined_call_operand.vmem [shape: bf16[32,16], index: 3, kind: input, shape index: {}]   ;;  %s1197_s4 = inlined_call_operand.vmem [shape: f32[32,1], index: 4, kind: input, shape index: {}]   ;;  %s1198_s5 = inlined_call_operand.vmem [shape: bf16[32,32], index: 5, kind: input, shape index: {}]   ;;  %s1199_s6 = inlined_call_operand.vmem [shape: f32[32,1], index: 6, kind: input, shape index: {}]   ;;  %s1200_s7 = inlined_call_operand.vmem [shape: bf16[1,32], index: 7, kind: input, shape index: {}]   ;;  %s1201_s8 = inlined_call_operand.<no memory space> [shape: f32[1,1], index: 8, kind: input, shape index: {}]   ;;  %s1202_s9 = inlined_call_operand.hbm [shape: f32[1,256], index: 9, kind: output, shape index: {}]  }
   0x1   :  { %v14_v0 = vstv %s1201_s8 }
   0x2   :  { %15 = vst [vmem:[#allocation2] sm:$0x1] %v14_v0 }
   0x3   :  { %16 = vsyncpa [#allocation5], 0 }
   0x4   :  { %18 = vsyncpa [#allocation5 + $0x1], 0  ;;  %s1023_s11 = smov 0   ;;  %s1025_s12 = smov 0  }
   0x5   :  { %s1027_s13 = smov 0   ;;  %s1029_s14 = smov 0  }
   0x6 LB: > { %s787_s8 = sadd.s32 4294967295, %s963_s14   ;;  %s788_s15 = sadd.s32 4294967294, %s963_s14   ;;  %s963_s14 = sphi %s1029_s14, %s1208_s14   ;;  %s959_s13 = sphi %s1027_s13, %s1207_s13   ;;  %s955_s12 = sphi %s1025_s12, %s1206_s12   ;;  %s951_s11 = sphi %s1023_s11, %s1205_s11  }
   0x7   : > { %s1046_s16 = sadd.s32 1, %s963_s14   ;;  %s31_s17 = sadd.s32 1, %s959_s13 }
   0x8   : > { %s28_s18 = ssub.s32 %s963_s14, %s1046_s16  ;;  %p38_p0 = scmp.ne.s32.totalorder %s959_s13, %s955_s12 }
   0x9   : > { %p29_p1 = scmp.eq.s32.totalorder %s28_s18, 0  ;;  %p39_p2 = scmp.eq.s32.totalorder %s963_s14, 0 }
   0xa   : > { %p236_p3 = scmp.eq.s32.totalorder %s787_s8, 1  ;;  %p241_p4 = scmp.ne.s32.totalorder %s955_s12, %s951_s11 }
   0xb   : > { %s1059_s19 = scalar_select %p29_p1, %s959_s13, %s31_s17  }
   0xc   : > { %p40_p5 = por %p39_p2, %p38_p0  ;;  %p1061_p6 = por %p236_p3, %p38_p0 }
   0xd   : > { %p242_p7 = scmp.eq.s32.totalorder %s788_s15, 1  ;;  %p790_p9 = scmp.ge.s32.totalorder %s963_s14, 2 }
   0xf   : > { %p1065_p8 = por %p242_p7, %p241_p4  ;;  %282 = sbr.rel (%p790_p9) target bundleno = 29 (0x1d), region = 48 }
  0x16   : > { %285 = sbr.rel (!%p40_p5) target bundleno = 29 (0x1d), region = 52  ;;  %s287_s22 = sand.u32 (%p40_p5), 1, %s959_s13  }
  0x17   : > { %s792_s23 = sshll.u32 (%p40_p5), %s963_s14, 2  ;;  %s791_s24 = sshll.u32 (%p40_p5), %s287_s22, 3 }
  0x18   : > { %s291_s27 = scalar_lea.vmem (%p40_p5), %s1193_s0, %s792_s23  ;;  %s289_s28 = scalar_lea.vmem (%p40_p5), [#allocation3], %s791_s24 }
  0x19   : > { %v307_v1 = vld [vmem:[%s291_s27] sm:$0xf] (%p40_p5)  ;;  %v309_v2 = vld [vmem:[%s291_s27 + $0x8] sm:$0xf] (%p40_p5) }
  0x1a   : > { %308 = vst [vmem:[%s289_s28] sm:$0xf] (%p40_p5), %v307_v1  ;;  %310 = vst [vmem:[%s289_s28 + $0x4] sm:$0xf] (%p40_p5), %v309_v2 }
  0x1d PF: > { %p793_p10 = scmp.ge.s32.totalorder %s963_s14, 1  ;;  %p336_p11 = scmp.lt.s32.totalorder %s963_s14, 3 }
  0x1f   : > { %p337_p12 = pnand %p793_p10, %p336_p11 }
  0x20   : > { %s1080_s29 = sand.u32 (!%p337_p12), 1, %s955_s12   ;;  %vm408_vm0 = vcmask (!%p337_p12), 1044480   ;;  %vm409_vm1 = vcmask (!%p337_p12), 1045504   ;;  %v965_v3 = vmov (!%p337_p12), 0.0   ;;  %v966_v4 = vmov (!%p337_p12), 65535   ;;  %v382_v7 = vld [vmem:[%s1195_s2] sm:$0xff] (!%p337_p12) }
  0x21   : > { %340 = sbr.rel (%p337_p12) target bundleno = 950 (0x3b6), region = 93  ;;  %822 = vmatprep.subr.bf16.mxu0 (!%p337_p12), %v965_v3  ;;  %s794_s30 = sshll.u32 (!%p337_p12), %s1080_s29, 3  ;;  %v410_v5 = vsel (!%p337_p12), %vm408_vm0, 4294967295, %v966_v4  ;;  %vm967_vm2 = vmmov (!%p337_p12), 0   ;;  %v968_v9 = vmov (!%p337_p12), 0   ;;  %v896_v11 = vld [vmem:[%s1194_s1] sm:$0xff] (!%p337_p12)  }
  0x22   : > { %v411_v6 = vsel (!%p337_p12), %vm409_vm1, %v410_v5, 0  ;;  %824 = vmatprep.mubr.msk.bf16.mxu0 (!%p337_p12), %vm967_vm2, %v965_v3  ;;  %s345_s17 = scalar_lea.vmem (!%p337_p12), [#allocation3], %s794_s30  ;;  %893 = vset.pattern.permute.xlu0 (!%p337_p12), %v968_v9  ;;  %vm404_vm3 = vcmask (!%p337_p12), 89088   ;;  %v383_v12 = vld [vmem:[%s1195_s2 + $0x8] sm:$0xff] (!%p337_p12)  ;;  %v465_v13 = vld [vmem:[%s1197_s4 + $0x10] sm:$0xff] (!%p337_p12)  ;;  %v563_v14 = vld [vmem:[%s1199_s6] sm:$0xff] (!%p337_p12) }
  0x23   : > { %v895_v8 = vld [vmem:[%s345_s17] sm:$0x3f] (!%p337_p12)   ;;  %894 = vset.pattern.permute.xlu1 (!%p337_p12), %v968_v9  ;;  %386 = vperm.xlu0 (!%p337_p12), %893, %v382_v7   ;;  %v565_v15 = vld [vmem:[%s1199_s6 + $0x10] sm:$0xff] (!%p337_p12)  ;;  %v660_v16 = vld [vmem:[#allocation2] sm:$0x1] (!%p337_p12)  ;;  %vm497_vm4 = vcmask (!%p337_p12), 130048  }
  0x24   : > { %v413_v10 = vand.u32 (!%p337_p12), %v895_v8, %v411_v6  ;;  %v897_v17 = vld [vmem:[%s1196_s3] sm:$0xff] (!%p337_p12)   ;;  %v464_v19 = vld [vmem:[%s1197_s4 + $0x8] sm:$0xff] (!%p337_p12)  ;;  %v466_v20 = vld [vmem:[%s1197_s4 + $0x18] sm:$0xff] (!%p337_p12)  ;;  %vm597_vm5 = vcmask (!%p337_p12), 261120   ;;  %s807_s27 = sshll.u32 (!%p337_p12), %s787_s8, 4  ;;  %s376_s28 = scalar_lea.vmem (!%p337_p12), [#allocation4], %s1080_s29 }
  0x25   : > { %830 = vmatprep.mubr.msk.bf16.mxu1 (!%p337_p12), %vm497_vm4, %v897_v17  ;;  %v463_v18 = vld [vmem:[%s1197_s4] sm:$0xff] (!%p337_p12)  ;;  %v564_v21 = vld [vmem:[%s1199_s6 + $0x8] sm:$0xff] (!%p337_p12)  ;;  %v566_v22 = vld [vmem:[%s1199_s6 + $0x18] sm:$0xff] (!%p337_p12)  ;;  %s727_s30 = sshll.u32 (!%p337_p12), %s376_s28, 4  ;;  %s1149_s17 = scalar_lea.hbm (!%p337_p12), %s1202_s9, %s807_s27  ;;  %s1151_s30 = int_to_ptr.vmem [resolvable:$true] %s727_s30 }
  0x26   : > { %823 = vmatpush3.bf16.msra.mxu0 (!%p337_p12), %v413_v10  ;;  %469 = vperm.xlu1 (!%p337_p12), %894, %v463_v18   ;;  %v898_v34 = vld [vmem:[%s1196_s3 + $0x8] sm:$0xff] (!%p337_p12)   ;;  %v899_v35 = vld [vmem:[%s1198_s5] sm:$0xff] (!%p337_p12)   ;;  %s715_s8 = scalar_lea.sflag (!%p337_p12), [#allocation5], %s1080_s29  ;;  %s901_s18 = scalar_lea.vmem (!%p337_p12), %s1151_s30, 16 }
  0x27   : > { %391 = vperm.xlu0 (!%p337_p12), %893, %v383_v12   ;;  %v900_v54 = vld [vmem:[%s1198_s5 + $0x8] sm:$0xff] (!%p337_p12)   ;;  %v657_v10 = vld [vmem:[%s1200_s7] sm:$0x1] (!%p337_p12)  ;;  %p902_p13 = scmp.ne.s32.totalorder (!%p337_p12), %s1151_s30, %s901_s18  ;;  %s969_s22 = smov (!%p337_p12), [#allocation4]  }
  0x28   : > { %s905_s23 = sshll.u32 %s969_s22, 4  ;;  %s906_s23 = int_to_ptr.vmem [resolvable:$false] %s905_s23 }
  0x29   : > { %825 = vmatmul.mubr.msk.bf16.vlgmr.msra.gmra.mrb[0].mxu0 %vm404_vm3, %v896_v11  ;;  %v666_v11 = vlaneseq  ;;  %p903_p0 = pnand %p902_p13, %p1061_p6  ;;  %s907_s24 = scalar_lea.vmem %s906_s23, 32 }
  0x2a   : > { %474 = vperm.xlu1 %894, %v464_v19   ;;  %838 = vmatprep.mubr.msk.bf16.mxu0 %vm597_vm5, %v899_v35  ;;  %p908_p2 = scmp.lt.s32.totalorder %s1151_s30, %s906_s23  ;;  %p909_p3 = scmp.lt.s32.totalorder %s907_s24, %s901_s18 }
  0x2b   : > { %479 = vperm.xlu0 %893, %v465_v13   ;;  %v667_v12 = vshrl.u32 %v666_v11, 7  ;;  %p904_p1 = pneg %p903_p0 }
  0x2c   : > { %p910_p4 = por %p909_p3, %p908_p2 }
  0x2d   : > { %v668_v13 = vsub.s32 0, %v667_v12 }
  0x2e   : > { %484 = vperm.xlu1 %894, %v466_v20   ;;  %p911_p5 = pnand %p910_p4, %p904_p1 }
  0x2f   : > { %569 = vperm.xlu0 %893, %v563_v14  }
  0x32   : > { %574 = vperm.xlu1 %894, %v564_v21  }
  0x33   : > { %579 = vperm.xlu0 %893, %v565_v15  }
  0x36   : > { %584 = vperm.xlu1 %894, %v566_v22  }
  0x37   : > { %663 = vperm.xlu0 %893, %v660_v16  }
  0xa2   : > { %v387_v23 = vpop.permute.xlu0 %386 }
  0xa5   : > { %v470_v36 = vpop.permute.xlu1 %469 }
  0xa6   : > { %v392_v27 = vpop.permute.xlu0 %391 }
  0xa9   : > { %v475_v37 = vpop.permute.xlu1 %474 }
  0xaa   : > { %v480_v38 = vpop.permute.xlu0 %479 }
  0xad   : > { %v485_v42 = vpop.permute.xlu1 %484 }
  0xae   : > { %v570_v55 = vpop.permute.xlu0 %569 }
  0xb1   : > { %v575_v56 = vpop.permute.xlu1 %574 }
  0xb2   : > { %v580_v57 = vpop.permute.xlu0 %579 }
  0xb5   : > { %v585_v61 = vpop.permute.xlu1 %584 }
  0xb6   : > { %v664_v14 = vpop.permute.xlu0 %663 }
  0xb7   : > { %v669_v15 = vrot.slane %v664_v14, %v668_v13 }
  0xfc   : > { %v449_v24 = vpop.f32.mrb[0].mxu0 }
  0xfd   : > { %v450_v25 = vadd.f32 %v449_v24, %v387_v23  ;;  %v826_v26 = vpop.f32.mrb[1].mxu0 }
  0xfe   : > { %v452_v28 = vpop.f32.mrb[2].mxu0 }
  0xff   : > { %v453_v29 = vadd.f32 %v452_v28, %v392_v27  ;;  %v827_v30 = vpop.f32.mrb[3].mxu0  ;;  %v456_v31 = vmax.f32 %v450_v25, 0.0 }
 0x101   : > { %v457_v32 = vmax.f32 %v453_v29, 0.0 }
 0x103   : > { %v462_v33 = vpack.c.bf16 %v457_v32, %v456_v31 }
 0x105   : > { %828 = vmatprep.subr.bf16.mxu1 %v462_v33 }
 0x106   : > { %829 = vmatpush3.bf16.msra.mxu1 %v462_v33 }
 0x107   : > { %842 = vmatprep.subr.bf16.mxu1 %v965_v3 }
 0x109   : > { %831 = vmatmul.mubr.msk.bf16.vlgmr.msra.gmra.mrb[0].mxu1 %vm497_vm4, %v898_v34 }
 0x10a   : > { %846 = vmatprep.mubr.msk.bf16.mxu1 %vm967_vm2, %v965_v3 }
 0x1dc   : > { %v832_v39 = vpop.f32.mrb[0].mxu1 }
 0x1dd   : > { %v547_v40 = vadd.f32 %v832_v39, %v480_v38  ;;  %v538_v41 = vpop.f32.mrb[1].mxu1 }
 0x1de   : > { %v539_v43 = vadd.f32 %v538_v41, %v470_v36  ;;  %v833_v44 = vpop.f32.mrb[2].mxu1 }
 0x1df   : > { %v550_v45 = vadd.f32 %v833_v44, %v485_v42  ;;  %v541_v46 = vpop.f32.mrb[3].mxu1  ;;  %v555_v48 = vmax.f32 %v547_v40, 0.0 }
 0x1e0   : > { %v542_v47 = vadd.f32 %v541_v46, %v475_v37  ;;  %v553_v50 = vmax.f32 %v539_v43, 0.0 }
 0x1e1   : > { %v556_v49 = vmax.f32 %v550_v45, 0.0 }
 0x1e2   : > { %v554_v51 = vmax.f32 %v542_v47, 0.0 }
 0x1e3   : > { %v562_v52 = vpack.c.bf16 %v556_v49, %v555_v48 }
 0x1e4   : > { %v561_v53 = vpack.c.bf16 %v554_v51, %v553_v50 }
 0x1e6   : > { %834 = vmatprep.subr.bf16.mxu0 %v561_v53 }
 0x1e7   : > { %835 = vmatpush3.bf16.msra.mxu0 %v561_v53 }
 0x1e8   : > { %836 = vmatprep.subr.bf16.mxu0 %v562_v52 }
 0x1eb   : > { %837 = vmatpush3.bf16.msra.mxu0 %v562_v52 }
 0x1ee   : > { %839 = vmatmul.mubr.msk.bf16.vlgmr.msra.gmra.mrb[4].mxu0 %vm597_vm5, %v900_v54 }
 0x2c1   : > { %v840_v58 = vpop.f32.mrb[4].mxu0 }
 0x2c2   : > { %v647_v59 = vadd.f32 %v840_v58, %v580_v57  ;;  %v638_v60 = vpop.f32.mrb[5].mxu0 }
 0x2c3   : > { %v639_v62 = vadd.f32 %v638_v60, %v570_v55  ;;  %v841_v63 = vpop.f32.mrb[6].mxu0 }
 0x2c4   : > { %v650_v0 = vadd.f32 %v841_v63, %v585_v61  ;;  %v641_v1 = vpop.f32.mrb[7].mxu0  ;;  %v655_v4 = vmax.f32 %v647_v59, 0.0 }
 0x2c5   : > { %v642_v2 = vadd.f32 %v641_v1, %v575_v56  ;;  %v653_v6 = vmax.f32 %v639_v62, 0.0 }
 0x2c6   : > { %v656_v5 = vmax.f32 %v650_v0, 0.0 }
 0x2c7   : > { %v654_v7 = vmax.f32 %v642_v2, 0.0 }
 0x2c8   : > { %v659_v8 = vpack.c.bf16 %v656_v5, %v655_v4 }
 0x2c9   : > { %v658_v9 = vpack.c.bf16 %v654_v7, %v653_v6 }
 0x2cb   : > { %843 = vmatpush3.bf16.msra.mxu1 %v658_v9 }
 0x2cc   : > { %844 = vmatprep.subr.bf16.mxu1 %v965_v3 }
 0x2cf   : > { %845 = vmatpush3.bf16.msra.mxu1 %v659_v8 }
 0x2d2   : > { %847 = vmatmul.mubr.msk.bf16.vlgmr.msra.gmra.mrb[4].mxu1 %vm597_vm5, %v657_v10 }
 0x3a5   : > { %v707_v16 = vpop.f32.mrb[4].mxu1 }
 0x3a6   : > { %v708_v3 = vadd.f32 %v707_v16, %v669_v15  ;;  %v848_v17 = vpop.f32.mrb[5].mxu1 }
 0x3a7   : > { %v710_v18 = vpop.f32.mrb[6].mxu1 }
 0x3a8   : > { %713 = vst [vmem:[%s376_s28] sm:$0x1] %v708_v3  ;;  %v849_v19 = vpop.f32.mrb[7].mxu1 }
 0x3a9   : > { %914 = shalt.err (!%p911_p5)
}
 0x3aa   : > { %s915_s29 = scalar_lea.hbm %s1149_s17, 16  ;;  %s919_s27 = scalar_lea.hbm %s1202_s9, 32 }
 0x3ab   : > { %p916_p7 = scmp.ne.s32.totalorder %s1149_s17, %s915_s29  ;;  %p920_p12 = scmp.lt.u32.totalorder %s1149_s17, %s1202_s9 }
 0x3ac   : > { %p921_p13 = scmp.lt.u32.totalorder %s919_s27, %s915_s29  ;;  %p923_p1 = scmp.lt.u32.totalorder %s915_s29, %s1149_s17 }
 0x3ad   : > { %p917_p10 = pnand %p916_p7, %p1061_p6 }
 0x3ae   : > { %p922_p0 = por %p921_p13, %p920_p12 }
 0x3af   : > { %p918_p11 = pneg %p917_p10 }
 0x3b0   : > { %p924_p2 = por %p923_p1, %p922_p0 }
 0x3b2   : > { %p925_p3 = pnand %p924_p2, %p918_p11 }
 0x3b4   : > { %928 = shalt.err (!%p925_p3)
}
 0x3b5   : > { %850 = dma.vmem_to_hbm [thread:$0]  (%p1061_p6), %s1151_s30, 16, %s1149_s17, %s715_s8  }
 0x3b6 PF: > { %s739_s15 = sand.u32 1, %s951_s11   ;;  %p853_p4 = pnand %p790_p9, %p1065_p8 }
 0x3b7   : > { %s740_s18 = scalar_lea.sflag [#allocation5], %s739_s15 }
 0x3b8   : > { %946 = dma.done.wait (!%p853_p4), %s740_s18, 16  }
 0x3b9   : > { %948 = vsyncadd (!%p853_p4), %s740_s18, 4294967280  ;;  %p21_p5 = scmp.ge.s32.totalorder %s1046_s16, 4   ;;  %s1205_s11 = smov %s955_s12 }
 0x3ba   : > { %s1206_s12 = smov %s959_s13  ;;  %s1207_s13 = smov %s1059_s19 }
 0x3bb   : > { %s1208_s14 = smov %s1046_s16  ;;  %23 = sbr.rel (!%p21_p5) target bundleno = 6 (0x6), region = 137 }
 0x3c2   :  { %744 = vsyncpa [#allocation5], 1 }
 0x3c3   :  { %746 = vsyncpa [#allocation5 + $0x1], 1 }

</bundles_post_ra>
